<compile_context>
chip_gen: v5e
topology: v5e:2x2
jax: 0.10.0
libtpu: 0.0.40
codegen_flags: <defaults>
</compile_context>

<pallas_src>
import functools

import jax
import jax.numpy as jnp
from jax.experimental import pallas as pl
from jax.experimental.pallas import tpu as pltpu

LN_EPS = 1e-5
NEG_SLOPE = 0.2       # GATv2Conv default negative_slope
LANE = 128
SUBLANE = 8


def _ru(x, m):
    return ((x + m - 1) // m) * m


def _pad2(a, rows, cols):
    return jnp.pad(a, ((0, rows - a.shape[0]), (0, cols - a.shape[1])))


def _pick_tile(n, cap):
    """(8-aligned) row tile <= cap; prefer >=2 grid steps (v7x has 2 TCs)."""
    n8 = _ru(max(n, 1), SUBLANE)
    if n8 <= 2 * SUBLANE:
        return n8
    return min(cap, _ru((n8 + 1) // 2, SUBLANE))


# ----------------------------------------------------------------------------
# Kernel A: fused LayerNorm + ReLU + dual GATv2 node projections (lin_l | lin_r)
# single N=2*HCp matmul (fills the 256-wide MXU), bf16 outputs
# ----------------------------------------------------------------------------
def node_proj_kernel(x_ref, g_ref, b_ref, wlr_ref, blr_ref,
                     xl_ref, xr_ref, *, inv_din, hcp):
    x = x_ref[...]
    mean = jnp.sum(x, axis=-1, keepdims=True) * inv_din
    ex2 = jnp.sum(x * x, axis=-1, keepdims=True) * inv_din
    inv_std = jax.lax.rsqrt(ex2 - mean * mean + LN_EPS)          # EUP
    h = (x - mean) * inv_std * g_ref[...] + b_ref[...]
    h = jnp.maximum(h, 0.0).astype(jnp.bfloat16)                 # MXU input dtype
    proj = (jnp.dot(h, wlr_ref[...], preferred_element_type=jnp.float32)
            + blr_ref[...])
    xl_ref[...] = proj[:, :hcp].astype(jnp.bfloat16)             # static 128-lane slice
    xr_ref[...] = proj[:, hcp:].astype(jnp.bfloat16)


def node_proj(x_pad, g, b, wlr, blr, *, dim_in, hcp, tile_n):
    np_, dp = x_pad.shape
    hcp2 = wlr.shape[1]
    kern = functools.partial(node_proj_kernel, inv_din=1.0 / float(dim_in), hcp=hcp)
    flops = int(2 * np_ * dp * hcp2)
    byt = int(np_ * dp * 4 + dp * hcp2 * 2 + np_ * hcp2 * 2)
    return pl.pallas_call(
        kern,
        out_shape=(jax.ShapeDtypeStruct((np_, hcp), jnp.bfloat16),
                   jax.ShapeDtypeStruct((np_, hcp), jnp.bfloat16)),
        grid=(np_ // tile_n,),
        in_specs=[
            pl.BlockSpec((tile_n, dp), lambda i: (i, 0)),
            pl.BlockSpec((1, dp), lambda i: (0, 0)),
            pl.BlockSpec((1, dp), lambda i: (0, 0)),
            pl.BlockSpec((dp, hcp2), lambda i: (0, 0)),
            pl.BlockSpec((1, hcp2), lambda i: (0, 0)),
        ],
        out_specs=(pl.BlockSpec((tile_n, hcp), lambda i: (i, 0)),
                   pl.BlockSpec((tile_n, hcp), lambda i: (i, 0))),
        compiler_params=pltpu.CompilerParams(
            dimension_semantics=("parallel",),
            vmem_limit_bytes=32 * 1024 * 1024),
        cost_estimate=pl.CostEstimate(flops=flops, transcendentals=np_,
                                      bytes_accessed=byt),
    )(x_pad, g, b, wlr, blr)


# ----------------------------------------------------------------------------
# Kernel B: fused edge-attr projection + z + LeakyReLU + per-head attention score
# (bf16 gathered node streams; score output has only ru(heads,8) lanes)
# ----------------------------------------------------------------------------
def edge_score_kernel(xls_ref, xrd_ref, ea_ref, we_ref, att_ref, score_ref):
    eproj = jnp.dot(ea_ref[...], we_ref[...], preferred_element_type=jnp.float32)
    z = (xls_ref[...].astype(jnp.float32)
         + xrd_ref[...].astype(jnp.float32) + eproj)
    z = jnp.where(z > 0, z, NEG_SLOPE * z)                       # LeakyReLU
    score_ref[...] = jnp.dot(z.astype(jnp.bfloat16), att_ref[...],
                             preferred_element_type=jnp.float32)


def edge_score(xl_src, xr_dst, ea_bf16, we, att_mat, *, tile_e):
    ep, hcp = xl_src.shape
    dep = ea_bf16.shape[1]
    hsp = att_mat.shape[1]
    flops = int(2 * ep * dep * hcp + 2 * ep * hcp * hsp)
    byt = int(ep * (2 * hcp * 2 + dep * 2 + hsp * 4)
              + dep * hcp * 2 + hcp * hsp * 2)
    return pl.pallas_call(
        edge_score_kernel,
        out_shape=jax.ShapeDtypeStruct((ep, hsp), jnp.float32),
        grid=(ep // tile_e,),
        in_specs=[
            pl.BlockSpec((tile_e, hcp), lambda i: (i, 0)),
            pl.BlockSpec((tile_e, hcp), lambda i: (i, 0)),
            pl.BlockSpec((tile_e, dep), lambda i: (i, 0)),
            pl.BlockSpec((dep, hcp), lambda i: (0, 0)),
            pl.BlockSpec((hcp, hsp), lambda i: (0, 0)),
        ],
        out_specs=pl.BlockSpec((tile_e, hsp), lambda i: (i, 0)),
        compiler_params=pltpu.CompilerParams(
            dimension_semantics=("parallel",),
            vmem_limit_bytes=32 * 1024 * 1024),
        cost_estimate=pl.CostEstimate(flops=flops, transcendentals=0,
                                      bytes_accessed=byt),
    )(xl_src, xr_dst, ea_bf16, we, att_mat)


# ----------------------------------------------------------------------------
# Kernel C: fused edge MLP  LayerNorm(cat) + ReLU + Linear + edge_attr residual
# (cat kept as two 128-lane halves -> two MXU dots; bf16 gathered inputs)
# ----------------------------------------------------------------------------
def edge_mlp_kernel(xs_ref, xd_ref, ea_ref, gs_ref, bs_ref, gd_ref, bd_ref,
                    ws_ref, wd_ref, bo_ref, o_ref, *, inv_f):
    xs = xs_ref[...].astype(jnp.float32)
    xd = xd_ref[...].astype(jnp.float32)
    mean = (jnp.sum(xs, axis=-1, keepdims=True)
            + jnp.sum(xd, axis=-1, keepdims=True)) * inv_f
    ex2 = (jnp.sum(xs * xs, axis=-1, keepdims=True)
           + jnp.sum(xd * xd, axis=-1, keepdims=True)) * inv_f
    inv_std = jax.lax.rsqrt(ex2 - mean * mean + LN_EPS)
    hs = jnp.maximum((xs - mean) * inv_std * gs_ref[...] + bs_ref[...], 0.0)
    hd = jnp.maximum((xd - mean) * inv_std * gd_ref[...] + bd_ref[...], 0.0)
    e = (jnp.dot(hs.astype(jnp.bfloat16), ws_ref[...],
                 preferred_element_type=jnp.float32)
         + jnp.dot(hd.astype(jnp.bfloat16), wd_ref[...],
                   preferred_element_type=jnp.float32)
         + bo_ref[...])
    o_ref[...] = ea_ref[...] + e


def edge_mlp(xs, xd, ea, gs, bs, gd, bd, ws, wd, bo, *, dim_cat, tile_e):
    ep, hcp = xs.shape
    dop = ws.shape[1]
    kern = functools.partial(edge_mlp_kernel, inv_f=1.0 / float(dim_cat))
    flops = int(2 * 2 * ep * hcp * dop)
    byt = int(ep * (2 * hcp * 2 + 2 * dop * 4) + 2 * hcp * dop * 2)
    return pl.pallas_call(
        kern,
        out_shape=jax.ShapeDtypeStruct((ep, dop), jnp.float32),
        grid=(ep // tile_e,),
        in_specs=[
            pl.BlockSpec((tile_e, hcp), lambda i: (i, 0)),
            pl.BlockSpec((tile_e, hcp), lambda i: (i, 0)),
            pl.BlockSpec((tile_e, dop), lambda i: (i, 0)),
            pl.BlockSpec((1, hcp), lambda i: (0, 0)),
            pl.BlockSpec((1, hcp), lambda i: (0, 0)),
            pl.BlockSpec((1, hcp), lambda i: (0, 0)),
            pl.BlockSpec((1, hcp), lambda i: (0, 0)),
            pl.BlockSpec((hcp, dop), lambda i: (0, 0)),
            pl.BlockSpec((hcp, dop), lambda i: (0, 0)),
            pl.BlockSpec((1, dop), lambda i: (0, 0)),
        ],
        out_specs=pl.BlockSpec((tile_e, dop), lambda i: (i, 0)),
        compiler_params=pltpu.CompilerParams(
            dimension_semantics=("parallel",),
            vmem_limit_bytes=32 * 1024 * 1024),
        cost_estimate=pl.CostEstimate(flops=flops, transcendentals=ep,
                                      bytes_accessed=byt),
    )(xs, xd, ea, gs, bs, gd, bd, ws, wd, bo)


# ----------------------------------------------------------------------------
# Module forward (index plumbing + segment softmax in plain JAX)
# ----------------------------------------------------------------------------
def deepgcn_edge_forward(params, x, edge_index, edge_attr, *, heads):
    N, dim_in = x.shape
    E, edge_dim = edge_attr.shape
    dim_out = params["mlp_w"].shape[1]
    assert dim_out % heads == 0
    C = dim_out // heads
    HC = heads * C
    assert dim_in == dim_out, "res+ residual requires dim_in == dim_out"

    # lane-dense padded sizes (multiples of 128) and (8,128)-aligned row tiles
    Dp = _ru(dim_in, LANE)
    HCp = _ru(HC, LANE)           # == Dp since dim_in == dim_out == HC
    Dep = _ru(edge_dim, LANE)
    Dop = _ru(dim_out, LANE)
    HSp = _ru(heads, SUBLANE)     # tiny score minor dim (no 128-lane padding)

    TN = _pick_tile(N, 1024)
    Np = _ru(N, TN)
    E_aug = E + N                                # + one self loop per node
    TEa = _pick_tile(E_aug, 2048)
    Eap = _ru(E_aug, TEa)
    TEm = _pick_tile(E, 2048)
    Ep = _ru(E, TEm)

    src, dst = edge_index[0], edge_index[1]

    # ----- padded params (matmul weights in bf16 for the MXU, f32 accumulate) --
    ln1_g = _pad2(params["ln1_g"], 1, Dp)
    ln1_b = _pad2(params["ln1_b"], 1, Dp)
    wl = _pad2(params["lin_l_w"], Dp, HCp)
    wr = _pad2(params["lin_r_w"], Dp, HCp)
    wlr = jnp.concatenate([wl, wr], axis=1).astype(jnp.bfloat16)   # one N=2*HCp dot
    bl = _pad2(params["lin_l_b"], 1, HCp)
    br = _pad2(params["lin_r_b"], 1, HCp)
    blr = jnp.concatenate([bl, br], axis=1)
    we = _pad2(params["lin_e_w"], Dep, HCp).astype(jnp.bfloat16)   # no bias in PyG
    gat_bias = _pad2(params["gat_bias"], 1, HCp)
    # block-diagonal attention matrix: per-head score via one narrow matmul
    att_mat = jnp.zeros((HCp, HSp), jnp.float32)
    att_mat = att_mat.at[jnp.arange(HC), jnp.arange(HC) // C].set(params["att"][0])
    att_mat = att_mat.astype(jnp.bfloat16)
    gs = _pad2(params["ln2_g"][:, :dim_out], 1, HCp)
    bs = _pad2(params["ln2_b"][:, :dim_out], 1, HCp)
    gd = _pad2(params["ln2_g"][:, dim_out:], 1, HCp)
    bd = _pad2(params["ln2_b"][:, dim_out:], 1, HCp)
    ws = _pad2(params["mlp_w"][:dim_out, :], HCp, Dop).astype(jnp.bfloat16)
    wd = _pad2(params["mlp_w"][dim_out:, :], HCp, Dop).astype(jnp.bfloat16)
    bo = _pad2(params["mlp_b"], 1, Dop)

    # ----- kernel A: h = ReLU(LN(x)); [x_l|x_r] = h@[Wl|Wr] + [bl|br] (bf16 out)
    # TODO(synk): Dropout(p=0.1) on h is treated as eval-mode identity.
    x_pad = _pad2(x, Np, Dp)
    x_l, x_r = node_proj(x_pad, ln1_g, ln1_b, wlr, blr,
                         dim_in=dim_in, hcp=HCp, tile_n=TN)

    # ----- self loops (PyG GATv2Conv add_self_loops=True, fill_value='mean') ---
    # TODO(synk): pre-existing self-loop edges are not removed/re-filled
    # (PyG remove_self_loops); only differs if the input graph already has loops.
    ar = jnp.arange(N, dtype=src.dtype)
    deg = jax.ops.segment_sum(jnp.ones((E, 1), jnp.float32), dst, num_segments=N)
    loop_attr = (jax.ops.segment_sum(edge_attr, dst, num_segments=N)
                 / jnp.maximum(deg, 1.0))
    src_a = jnp.concatenate([src, ar])
    dst_a = jnp.concatenate([dst, ar])
    ea_a = jnp.concatenate([edge_attr, loop_attr], axis=0)
    pad_e = Eap - E_aug
    src_ap = jnp.concatenate([src_a, jnp.zeros((pad_e,), src.dtype)])
    dst_ap = jnp.concatenate([dst_a, jnp.zeros((pad_e,), dst.dtype)])
    ea_ap = _pad2(ea_a, Eap, Dep).astype(jnp.bfloat16)
    valid = (jnp.arange(Eap) < E_aug).astype(jnp.float32)[:, None]

    # index-based gathers, O(E*F), bf16 streams (half the HBM traffic of f32)
    # TODO(synk): in-kernel DMA gather (scalar-prefetch src/dst + pl.ANY x_l/x_r,
    # per-row make_async_copy) would avoid the HBM round-trip entirely; left to
    # XLA's gather/segment ops for now.
    xl_src = jnp.take(x_l, src_ap, axis=0)
    xr_dst = jnp.take(x_r, dst_ap, axis=0)

    # ----- kernel B: fused edge projection + LeakyReLU + per-head scores -------
    score = edge_score(xl_src, xr_dst, ea_ap, we, att_mat, tile_e=TEa)

    # ----- segment softmax over destination nodes, O(E*H) state ----------------
    s = jnp.where(valid > 0, score[:, :heads], -1e30)
    m = jax.ops.segment_max(s, dst_ap, num_segments=Np)
    m = jnp.maximum(m, -1e30)                      # guard empty (padded) segments
    p = jnp.exp(s - m[dst_ap]) * valid
    denom = jax.ops.segment_sum(p, dst_ap, num_segments=Np)
    alpha = p / (denom[dst_ap] + 1e-16)
    # repeat-across-lanes + multiply fuses into the scatter's input fusion
    alpha_hc = jnp.pad(jnp.repeat(alpha, C, axis=1), ((0, 0), (0, HCp - HC)))
    msg = alpha_hc * xl_src                        # f32 * bf16 -> f32 accumulate
    agg = jax.ops.segment_sum(msg, dst_ap, num_segments=Np)

    # res+ residual + GATv2 output bias
    x_new_pad = x_pad + agg + gat_bias

    # ----- kernel C: edge MLP on cat[x_new[src], x_new[dst]] + residual --------
    pad_m = Ep - E
    src_p = jnp.concatenate([src, jnp.zeros((pad_m,), src.dtype)])
    dst_p = jnp.concatenate([dst, jnp.zeros((pad_m,), dst.dtype)])
    x_new_bf16 = x_new_pad.astype(jnp.bfloat16)    # gather streams in bf16
    xs_g = jnp.take(x_new_bf16, src_p, axis=0)
    xd_g = jnp.take(x_new_bf16, dst_p, axis=0)
    ea_p = _pad2(edge_attr, Ep, Dop)
    new_ea = edge_mlp(xs_g, xd_g, ea_p, gs, bs, gd, bd, ws, wd, bo,
                      dim_cat=2 * dim_out, tile_e=TEm)

    return x_new_pad[:N, :dim_out], new_ea[:E, :dim_out]


# ----------------------------------------------------------------------------
# Deterministic parameter init (shapes per module __init__)
# ----------------------------------------------------------------------------
def init_params(key, dim_in, dim_out, heads, edge_dim):
    C = dim_out // heads
    HC = heads * C
    ks = jax.random.split(key, 5)

    def glorot(k, shape):
        lim = (6.0 / (shape[0] + shape[1])) ** 0.5
        return jax.random.uniform(k, shape, jnp.float32, -lim, lim)

    return dict(
        # DeepGCNLayer norm = LayerNorm(dim_in)
        ln1_g=jnp.ones((1, dim_in), jnp.float32),
        ln1_b=jnp.zeros((1, dim_in), jnp.float32),
        # GATv2Conv(dim_in, dim_out//heads, heads, edge_dim)
        lin_l_w=glorot(ks[0], (dim_in, HC)),
        lin_l_b=jnp.zeros((1, HC), jnp.float32),
        lin_r_w=glorot(ks[1], (dim_in, HC)),
        lin_r_b=jnp.zeros((1, HC), jnp.float32),
        lin_e_w=glorot(ks[2], (edge_dim, HC)),     # lin_edge has no bias
        att=glorot(ks[3], (1, HC)),                # [heads, C] flattened head-major
        gat_bias=jnp.zeros((1, HC), jnp.float32),
        # edgeMLP = LayerNorm(2*dim_out) -> ReLU -> Linear(2*dim_out, dim_out)
        ln2_g=jnp.ones((1, 2 * dim_out), jnp.float32),
        ln2_b=jnp.zeros((1, 2 * dim_out), jnp.float32),
        mlp_w=glorot(ks[4], (2 * dim_out, dim_out)),
        mlp_b=jnp.zeros((1, dim_out), jnp.float32),
    )


if __name__ == "__main__":
    N, E = 8, 16
    dim_in = dim_out = 32
    heads = 2

    key = jax.random.PRNGKey(0)
    kx, ke, ks_, ko, kp = jax.random.split(key, 5)
    x = jax.random.normal(kx, (N, dim_in), jnp.float32)
    edge_attr = jax.random.normal(ke, (E, dim_out), jnp.float32)
    src = jax.random.randint(ks_, (E,), 0, N)
    off = jax.random.randint(ko, (E,), 1, N)      # avoid self-loops in the input
    dst = (src + off) % N
    edge_index = jnp.stack([src, dst]).astype(jnp.int32)

    params = init_params(kp, dim_in, dim_out, heads, edge_dim=dim_out)

    fwd = jax.jit(functools.partial(deepgcn_edge_forward, heads=heads))
    x_new, edge_attr_new = fwd(params, x, edge_index, edge_attr)
    jax.block_until_ready((x_new, edge_attr_new))

    assert x_new.shape == (N, dim_out)
    assert edge_attr_new.shape == (E, dim_out)
    assert bool(jnp.all(jnp.isfinite(x_new)))
    assert bool(jnp.all(jnp.isfinite(edge_attr_new)))
    print("KERNEL_OK")
</pallas_src>

<mosaic_0001>
module attributes {stable_mosaic.version = 11 : i64} {
  func.func @node_proj_kernel(%arg0: i32, %arg1: memref<8x128xf32, #tpu.memory_space<vmem>>, %arg2: memref<1x128xf32, #tpu.memory_space<vmem>>, %arg3: memref<1x128xf32, #tpu.memory_space<vmem>>, %arg4: memref<128x256xbf16, #tpu.memory_space<vmem>>, %arg5: memref<1x256xf32, #tpu.memory_space<vmem>>, %arg6: memref<8x128xbf16, #tpu.memory_space<vmem>>, %arg7: memref<8x128xbf16, #tpu.memory_space<vmem>>) attributes {dimension_semantics = [#tpu.dimension_semantics<parallel>], iteration_bounds = array<i64: 1>, scalar_prefetch = 0 : i64, scratch_operands = 0 : i64, tpu.core_type = #tpu.core_type<tc>, window_params = [{transform_indices = @transform_0, window_bounds = array<i64: 8, 128>}, {pipeline_mode = #tpu.pipeline_mode<synchronous>, transform_indices = @transform_1, window_bounds = array<i64: 1, 128>}, {pipeline_mode = #tpu.pipeline_mode<synchronous>, transform_indices = @transform_2, window_bounds = array<i64: 1, 128>}, {pipeline_mode = #tpu.pipeline_mode<synchronous>, transform_indices = @transform_3, window_bounds = array<i64: 128, 256>}, {pipeline_mode = #tpu.pipeline_mode<synchronous>, transform_indices = @transform_4, window_bounds = array<i64: 1, 256>}, {transform_indices = @transform_5, window_bounds = array<i64: 8, 128>}, {transform_indices = @transform_6, window_bounds = array<i64: 8, 128>}]} {
    %c0 = arith.constant 0 : index
    %c0_0 = arith.constant 0 : index
    %0 = vector.load %arg1[%c0, %c0_0] : memref<8x128xf32, #tpu.memory_space<vmem>>, vector<8x128xf32>
    %cst = arith.constant dense<0.000000e+00> : vector<8xf32>
    %1 = vector.multi_reduction <add>, %0, %cst [1] : vector<8x128xf32> to vector<8xf32>
    %2 = vector.shape_cast %1 : vector<8xf32> to vector<8x1xf32>
    %cst_1 = arith.constant 3.125000e-02 : f32
    %3 = vector.broadcast %cst_1 : f32 to vector<8x1xf32>
    %4 = arith.mulf %2, %3 : vector<8x1xf32>
    %5 = arith.mulf %0, %0 : vector<8x128xf32>
    %cst_2 = arith.constant dense<0.000000e+00> : vector<8xf32>
    %6 = vector.multi_reduction <add>, %5, %cst_2 [1] : vector<8x128xf32> to vector<8xf32>
    %7 = vector.shape_cast %6 : vector<8xf32> to vector<8x1xf32>
    %cst_3 = arith.constant 3.125000e-02 : f32
    %8 = vector.broadcast %cst_3 : f32 to vector<8x1xf32>
    %9 = arith.mulf %7, %8 : vector<8x1xf32>
    %10 = arith.mulf %4, %4 : vector<8x1xf32>
    %11 = arith.subf %9, %10 : vector<8x1xf32>
    %cst_4 = arith.constant 9.99999974E-6 : f32
    %12 = vector.broadcast %cst_4 : f32 to vector<8x1xf32>
    %13 = arith.addf %11, %12 : vector<8x1xf32>
    %14 = math.rsqrt %13 : vector<8x1xf32>
    %15 = vector.broadcast %4 : vector<8x1xf32> to vector<8x128xf32>
    %16 = arith.subf %0, %15 : vector<8x128xf32>
    %17 = vector.broadcast %14 : vector<8x1xf32> to vector<8x128xf32>
    %18 = arith.mulf %16, %17 : vector<8x128xf32>
    %c0_5 = arith.constant 0 : index
    %c0_6 = arith.constant 0 : index
    %19 = vector.load %arg2[%c0_5, %c0_6] : memref<1x128xf32, #tpu.memory_space<vmem>>, vector<1x128xf32>
    %20 = vector.broadcast %19 : vector<1x128xf32> to vector<8x128xf32>
    %21 = arith.mulf %18, %20 : vector<8x128xf32>
    %c0_7 = arith.constant 0 : index
    %c0_8 = arith.constant 0 : index
    %22 = vector.load %arg3[%c0_7, %c0_8] : memref<1x128xf32, #tpu.memory_space<vmem>>, vector<1x128xf32>
    %23 = vector.broadcast %22 : vector<1x128xf32> to vector<8x128xf32>
    %24 = arith.addf %21, %23 : vector<8x128xf32>
    %cst_9 = arith.constant 0.000000e+00 : f32
    %25 = vector.broadcast %cst_9 : f32 to vector<8x128xf32>
    %26 = arith.maximumf %24, %25 : vector<8x128xf32>
    %27 = arith.truncf %26 : vector<8x128xf32> to vector<8x128xbf16>
    %c0_10 = arith.constant 0 : index
    %c0_11 = arith.constant 0 : index
    %28 = vector.load %arg4[%c0_10, %c0_11] : memref<128x256xbf16, #tpu.memory_space<vmem>>, vector<128x256xbf16>
    %cst_12 = arith.constant dense<0.000000e+00> : vector<8x256xf32>
    %29 = tpu.matmul %27, %28, %cst_12 {dimension_numbers = #tpu.dot_dimension_numbers<[1], [0], [0], [1], [0, 0, 1, 1], [], []>} : vector<8x128xbf16>, vector<128x256xbf16>, vector<8x256xf32> -> vector<8x256xf32>
    %c0_13 = arith.constant 0 : index
    %c0_14 = arith.constant 0 : index
    %30 = vector.load %arg5[%c0_13, %c0_14] : memref<1x256xf32, #tpu.memory_space<vmem>>, vector<1x256xf32>
    %31 = vector.broadcast %30 : vector<1x256xf32> to vector<8x256xf32>
    %32 = arith.addf %29, %31 : vector<8x256xf32>
    %33 = vector.extract_strided_slice %32 {offsets = [0, 0], sizes = [8, 128], strides = [1, 1]} : vector<8x256xf32> to vector<8x128xf32>
    %34 = arith.truncf %33 : vector<8x128xf32> to vector<8x128xbf16>
    %c0_15 = arith.constant 0 : index
    %c0_16 = arith.constant 0 : index
    %35 = vector.load %arg6[%c0_15, %c0_16] : memref<8x128xbf16, #tpu.memory_space<vmem>>, vector<8x128xbf16>
    tpu.vector_store %arg6[%c0_15, %c0_16], %34 {strides = array<i32>} : memref<8x128xbf16, #tpu.memory_space<vmem>>, vector<8x128xbf16>,
    %36 = vector.extract_strided_slice %32 {offsets = [0, 128], sizes = [8, 128], strides = [1, 1]} : vector<8x256xf32> to vector<8x128xf32>
    %37 = arith.truncf %36 : vector<8x128xf32> to vector<8x128xbf16>
    %c0_17 = arith.constant 0 : index
    %c0_18 = arith.constant 0 : index
    %38 = vector.load %arg7[%c0_17, %c0_18] : memref<8x128xbf16, #tpu.memory_space<vmem>>, vector<8x128xbf16>
    tpu.vector_store %arg7[%c0_17, %c0_18], %37 {strides = array<i32>} : memref<8x128xbf16, #tpu.memory_space<vmem>>, vector<8x128xbf16>,
    return
  }
  func.func @transform_0(%arg0: i32) -> (i32, i32) {
    %c0_i32 = arith.constant 0 : i32
    %c0_i32_0 = arith.constant 0 : i32
    return %arg0, %c0_i32 : i32, i32
  }
  func.func @transform_1(%arg0: i32) -> (i32, i32) {
    %c0_i32 = arith.constant 0 : i32
    %c0_i32_0 = arith.constant 0 : i32
    %c0_i32_1 = arith.constant 0 : i32
    return %c0_i32, %c0_i32_0 : i32, i32
  }
  func.func @transform_2(%arg0: i32) -> (i32, i32) {
    %c0_i32 = arith.constant 0 : i32
    %c0_i32_0 = arith.constant 0 : i32
    %c0_i32_1 = arith.constant 0 : i32
    return %c0_i32, %c0_i32_0 : i32, i32
  }
  func.func @transform_3(%arg0: i32) -> (i32, i32) {
    %c0_i32 = arith.constant 0 : i32
    %c0_i32_0 = arith.constant 0 : i32
    %c0_i32_1 = arith.constant 0 : i32
    return %c0_i32, %c0_i32_0 : i32, i32
  }
  func.func @transform_4(%arg0: i32) -> (i32, i32) {
    %c0_i32 = arith.constant 0 : i32
    %c0_i32_0 = arith.constant 0 : i32
    %c0_i32_1 = arith.constant 0 : i32
    return %c0_i32, %c0_i32_0 : i32, i32
  }
  func.func @transform_5(%arg0: i32) -> (i32, i32) {
    %c0_i32 = arith.constant 0 : i32
    %c0_i32_0 = arith.constant 0 : i32
    return %arg0, %c0_i32 : i32, i32
  }
  func.func @transform_6(%arg0: i32) -> (i32, i32) {
    %c0_i32 = arith.constant 0 : i32
    %c0_i32_0 = arith.constant 0 : i32
    return %arg0, %c0_i32 : i32, i32
  }
}

module attributes {stable_mosaic.version = 11 : i64} {
  func.func @edge_score_kernel(%arg0: i32, %arg1: memref<16x128xbf16, #tpu.memory_space<vmem>>, %arg2: memref<16x128xbf16, #tpu.memory_space<vmem>>, %arg3: memref<16x128xbf16, #tpu.memory_space<vmem>>, %arg4: memref<128x128xbf16, #tpu.memory_space<vmem>>, %arg5: memref<128x8xbf16, #tpu.memory_space<vmem>>, %arg6: memref<16x8xf32, #tpu.memory_space<vmem>>) attributes {dimension_semantics = [#tpu.dimension_semantics<parallel>], iteration_bounds = array<i64: 2>, scalar_prefetch = 0 : i64, scratch_operands = 0 : i64, tpu.core_type = #tpu.core_type<tc>, window_params = [{transform_indices = @transform_0, window_bounds = array<i64: 16, 128>}, {transform_indices = @transform_1, window_bounds = array<i64: 16, 128>}, {transform_indices = @transform_2, window_bounds = array<i64: 16, 128>}, {pipeline_mode = #tpu.pipeline_mode<synchronous>, transform_indices = @transform_3, window_bounds = array<i64: 128, 128>}, {pipeline_mode = #tpu.pipeline_mode<synchronous>, transform_indices = @transform_4, window_bounds = array<i64: 128, 8>}, {transform_indices = @transform_5, window_bounds = array<i64: 16, 8>}]} {
    %c0 = arith.constant 0 : index
    %c0_0 = arith.constant 0 : index
    %0 = vector.load %arg3[%c0, %c0_0] : memref<16x128xbf16, #tpu.memory_space<vmem>>, vector<16x128xbf16>
    %c0_1 = arith.constant 0 : index
    %c0_2 = arith.constant 0 : index
    %1 = vector.load %arg4[%c0_1, %c0_2] : memref<128x128xbf16, #tpu.memory_space<vmem>>, vector<128x128xbf16>
    %cst = arith.constant dense<0.000000e+00> : vector<16x128xf32>
    %2 = tpu.matmul %0, %1, %cst {dimension_numbers = #tpu.dot_dimension_numbers<[1], [0], [0], [1], [0, 0, 1, 1], [], []>} : vector<16x128xbf16>, vector<128x128xbf16>, vector<16x128xf32> -> vector<16x128xf32>
    %c0_3 = arith.constant 0 : index
    %c0_4 = arith.constant 0 : index
    %3 = vector.load %arg1[%c0_3, %c0_4] : memref<16x128xbf16, #tpu.memory_space<vmem>>, vector<16x128xbf16>
    %4 = arith.extf %3 : vector<16x128xbf16> to vector<16x128xf32>
    %c0_5 = arith.constant 0 : index
    %c0_6 = arith.constant 0 : index
    %5 = vector.load %arg2[%c0_5, %c0_6] : memref<16x128xbf16, #tpu.memory_space<vmem>>, vector<16x128xbf16>
    %6 = arith.extf %5 : vector<16x128xbf16> to vector<16x128xf32>
    %7 = arith.addf %4, %6 : vector<16x128xf32>
    %8 = arith.addf %7, %2 : vector<16x128xf32>
    %cst_7 = arith.constant 0.000000e+00 : f32
    %9 = vector.broadcast %cst_7 : f32 to vector<16x128xf32>
    %10 = arith.cmpf ogt, %8, %9 : vector<16x128xf32>
    %cst_8 = arith.constant 2.000000e-01 : f32
    %11 = vector.broadcast %cst_8 : f32 to vector<16x128xf32>
    %12 = arith.mulf %11, %8 : vector<16x128xf32>
    %13 = arith.select %10, %8, %12 : vector<16x128xi1>, vector<16x128xf32>
    %14 = arith.truncf %13 : vector<16x128xf32> to vector<16x128xbf16>
    %c0_9 = arith.constant 0 : index
    %c0_10 = arith.constant 0 : index
    %15 = vector.load %arg5[%c0_9, %c0_10] : memref<128x8xbf16, #tpu.memory_space<vmem>>, vector<128x8xbf16>
    %cst_11 = arith.constant dense<0.000000e+00> : vector<16x8xf32>
    %16 = tpu.matmul %14, %15, %cst_11 {dimension_numbers = #tpu.dot_dimension_numbers<[1], [0], [0], [1], [0, 0, 1, 1], [], []>} : vector<16x128xbf16>, vector<128x8xbf16>, vector<16x8xf32> -> vector<16x8xf32>
    %c0_12 = arith.constant 0 : index
    %c0_13 = arith.constant 0 : index
    %17 = vector.load %arg6[%c0_12, %c0_13] : memref<16x8xf32, #tpu.memory_space<vmem>>, vector<16x8xf32>
    tpu.vector_store %arg6[%c0_12, %c0_13], %16 {strides = array<i32>} : memref<16x8xf32, #tpu.memory_space<vmem>>, vector<16x8xf32>,
    return
  }
  func.func @transform_0(%arg0: i32) -> (i32, i32) {
    %c0_i32 = arith.constant 0 : i32
    %c0_i32_0 = arith.constant 0 : i32
    return %arg0, %c0_i32 : i32, i32
  }
  func.func @transform_1(%arg0: i32) -> (i32, i32) {
    %c0_i32 = arith.constant 0 : i32
    %c0_i32_0 = arith.constant 0 : i32
    return %arg0, %c0_i32 : i32, i32
  }
  func.func @transform_2(%arg0: i32) -> (i32, i32) {
    %c0_i32 = arith.constant 0 : i32
    %c0_i32_0 = arith.constant 0 : i32
    return %arg0, %c0_i32 : i32, i32
  }
  func.func @transform_3(%arg0: i32) -> (i32, i32) {
    %c0_i32 = arith.constant 0 : i32
    %c0_i32_0 = arith.constant 0 : i32
    %c0_i32_1 = arith.constant 0 : i32
    return %c0_i32, %c0_i32_0 : i32, i32
  }
  func.func @transform_4(%arg0: i32) -> (i32, i32) {
    %c0_i32 = arith.constant 0 : i32
    %c0_i32_0 = arith.constant 0 : i32
    %c0_i32_1 = arith.constant 0 : i32
    return %c0_i32, %c0_i32_0 : i32, i32
  }
  func.func @transform_5(%arg0: i32) -> (i32, i32) {
    %c0_i32 = arith.constant 0 : i32
    %c0_i32_0 = arith.constant 0 : i32
    return %arg0, %c0_i32 : i32, i32
  }
}

module attributes {stable_mosaic.version = 11 : i64} {
  func.func @edge_mlp_kernel(%arg0: i32, %arg1: memref<16x128xbf16, #tpu.memory_space<vmem>>, %arg2: memref<16x128xbf16, #tpu.memory_space<vmem>>, %arg3: memref<16x128xf32, #tpu.memory_space<vmem>>, %arg4: memref<1x128xf32, #tpu.memory_space<vmem>>, %arg5: memref<1x128xf32, #tpu.memory_space<vmem>>, %arg6: memref<1x128xf32, #tpu.memory_space<vmem>>, %arg7: memref<1x128xf32, #tpu.memory_space<vmem>>, %arg8: memref<128x128xbf16, #tpu.memory_space<vmem>>, %arg9: memref<128x128xbf16, #tpu.memory_space<vmem>>, %arg10: memref<1x128xf32, #tpu.memory_space<vmem>>, %arg11: memref<16x128xf32, #tpu.memory_space<vmem>>) attributes {dimension_semantics = [#tpu.dimension_semantics<parallel>], iteration_bounds = array<i64: 1>, scalar_prefetch = 0 : i64, scratch_operands = 0 : i64, tpu.core_type = #tpu.core_type<tc>, window_params = [{transform_indices = @transform_0, window_bounds = array<i64: 16, 128>}, {transform_indices = @transform_1, window_bounds = array<i64: 16, 128>}, {transform_indices = @transform_2, window_bounds = array<i64: 16, 128>}, {pipeline_mode = #tpu.pipeline_mode<synchronous>, transform_indices = @transform_3, window_bounds = array<i64: 1, 128>}, {pipeline_mode = #tpu.pipeline_mode<synchronous>, transform_indices = @transform_4, window_bounds = array<i64: 1, 128>}, {pipeline_mode = #tpu.pipeline_mode<synchronous>, transform_indices = @transform_5, window_bounds = array<i64: 1, 128>}, {pipeline_mode = #tpu.pipeline_mode<synchronous>, transform_indices = @transform_6, window_bounds = array<i64: 1, 128>}, {pipeline_mode = #tpu.pipeline_mode<synchronous>, transform_indices = @transform_7, window_bounds = array<i64: 128, 128>}, {pipeline_mode = #tpu.pipeline_mode<synchronous>, transform_indices = @transform_8, window_bounds = array<i64: 128, 128>}, {pipeline_mode = #tpu.pipeline_mode<synchronous>, transform_indices = @transform_9, window_bounds = array<i64: 1, 128>}, {transform_indices = @transform_10, window_bounds = array<i64: 16, 128>}]} {
    %c0 = arith.constant 0 : index
    %c0_0 = arith.constant 0 : index
    %0 = vector.load %arg1[%c0, %c0_0] : memref<16x128xbf16, #tpu.memory_space<vmem>>, vector<16x128xbf16>
    %1 = arith.extf %0 : vector<16x128xbf16> to vector<16x128xf32>
    %c0_1 = arith.constant 0 : index
    %c0_2 = arith.constant 0 : index
    %2 = vector.load %arg2[%c0_1, %c0_2] : memref<16x128xbf16, #tpu.memory_space<vmem>>, vector<16x128xbf16>
    %3 = arith.extf %2 : vector<16x128xbf16> to vector<16x128xf32>
    %cst = arith.constant dense<0.000000e+00> : vector<16xf32>
    %4 = vector.multi_reduction <add>, %1, %cst [1] : vector<16x128xf32> to vector<16xf32>
    %5 = vector.shape_cast %4 : vector<16xf32> to vector<16x1xf32>
    %cst_3 = arith.constant dense<0.000000e+00> : vector<16xf32>
    %6 = vector.multi_reduction <add>, %3, %cst_3 [1] : vector<16x128xf32> to vector<16xf32>
    %7 = vector.shape_cast %6 : vector<16xf32> to vector<16x1xf32>
    %8 = arith.addf %5, %7 : vector<16x1xf32>
    %cst_4 = arith.constant 1.562500e-02 : f32
    %9 = vector.broadcast %cst_4 : f32 to vector<16x1xf32>
    %10 = arith.mulf %8, %9 : vector<16x1xf32>
    %11 = arith.mulf %1, %1 : vector<16x128xf32>
    %cst_5 = arith.constant dense<0.000000e+00> : vector<16xf32>
    %12 = vector.multi_reduction <add>, %11, %cst_5 [1] : vector<16x128xf32> to vector<16xf32>
    %13 = vector.shape_cast %12 : vector<16xf32> to vector<16x1xf32>
    %14 = arith.mulf %3, %3 : vector<16x128xf32>
    %cst_6 = arith.constant dense<0.000000e+00> : vector<16xf32>
    %15 = vector.multi_reduction <add>, %14, %cst_6 [1] : vector<16x128xf32> to vector<16xf32>
    %16 = vector.shape_cast %15 : vector<16xf32> to vector<16x1xf32>
    %17 = arith.addf %13, %16 : vector<16x1xf32>
    %cst_7 = arith.constant 1.562500e-02 : f32
    %18 = vector.broadcast %cst_7 : f32 to vector<16x1xf32>
    %19 = arith.mulf %17, %18 : vector<16x1xf32>
    %20 = arith.mulf %10, %10 : vector<16x1xf32>
    %21 = arith.subf %19, %20 : vector<16x1xf32>
    %cst_8 = arith.constant 9.99999974E-6 : f32
    %22 = vector.broadcast %cst_8 : f32 to vector<16x1xf32>
    %23 = arith.addf %21, %22 : vector<16x1xf32>
    %24 = math.rsqrt %23 : vector<16x1xf32>
    %25 = vector.broadcast %10 : vector<16x1xf32> to vector<16x128xf32>
    %26 = arith.subf %1, %25 : vector<16x128xf32>
    %27 = vector.broadcast %24 : vector<16x1xf32> to vector<16x128xf32>
    %28 = arith.mulf %26, %27 : vector<16x128xf32>
    %c0_9 = arith.constant 0 : index
    %c0_10 = arith.constant 0 : index
    %29 = vector.load %arg4[%c0_9, %c0_10] : memref<1x128xf32, #tpu.memory_space<vmem>>, vector<1x128xf32>
    %30 = vector.broadcast %29 : vector<1x128xf32> to vector<16x128xf32>
    %31 = arith.mulf %28, %30 : vector<16x128xf32>
    %c0_11 = arith.constant 0 : index
    %c0_12 = arith.constant 0 : index
    %32 = vector.load %arg5[%c0_11, %c0_12] : memref<1x128xf32, #tpu.memory_space<vmem>>, vector<1x128xf32>
    %33 = vector.broadcast %32 : vector<1x128xf32> to vector<16x128xf32>
    %34 = arith.addf %31, %33 : vector<16x128xf32>
    %cst_13 = arith.constant 0.000000e+00 : f32
    %35 = vector.broadcast %cst_13 : f32 to vector<16x128xf32>
    %36 = arith.maximumf %34, %35 : vector<16x128xf32>
    %37 = vector.broadcast %10 : vector<16x1xf32> to vector<16x128xf32>
    %38 = arith.subf %3, %37 : vector<16x128xf32>
    %39 = vector.broadcast %24 : vector<16x1xf32> to vector<16x128xf32>
    %40 = arith.mulf %38, %39 : vector<16x128xf32>
    %c0_14 = arith.constant 0 : index
    %c0_15 = arith.constant 0 : index
    %41 = vector.load %arg6[%c0_14, %c0_15] : memref<1x128xf32, #tpu.memory_space<vmem>>, vector<1x128xf32>
    %42 = vector.broadcast %41 : vector<1x128xf32> to vector<16x128xf32>
    %43 = arith.mulf %40, %42 : vector<16x128xf32>
    %c0_16 = arith.constant 0 : index
    %c0_17 = arith.constant 0 : index
    %44 = vector.load %arg7[%c0_16, %c0_17] : memref<1x128xf32, #tpu.memory_space<vmem>>, vector<1x128xf32>
    %45 = vector.broadcast %44 : vector<1x128xf32> to vector<16x128xf32>
    %46 = arith.addf %43, %45 : vector<16x128xf32>
    %cst_18 = arith.constant 0.000000e+00 : f32
    %47 = vector.broadcast %cst_18 : f32 to vector<16x128xf32>
    %48 = arith.maximumf %46, %47 : vector<16x128xf32>
    %49 = arith.truncf %36 : vector<16x128xf32> to vector<16x128xbf16>
    %c0_19 = arith.constant 0 : index
    %c0_20 = arith.constant 0 : index
    %50 = vector.load %arg8[%c0_19, %c0_20] : memref<128x128xbf16, #tpu.memory_space<vmem>>, vector<128x128xbf16>
    %cst_21 = arith.constant dense<0.000000e+00> : vector<16x128xf32>
    %51 = tpu.matmul %49, %50, %cst_21 {dimension_numbers = #tpu.dot_dimension_numbers<[1], [0], [0], [1], [0, 0, 1, 1], [], []>} : vector<16x128xbf16>, vector<128x128xbf16>, vector<16x128xf32> -> vector<16x128xf32>
    %52 = arith.truncf %48 : vector<16x128xf32> to vector<16x128xbf16>
    %c0_22 = arith.constant 0 : index
    %c0_23 = arith.constant 0 : index
    %53 = vector.load %arg9[%c0_22, %c0_23] : memref<128x128xbf16, #tpu.memory_space<vmem>>, vector<128x128xbf16>
    %cst_24 = arith.constant dense<0.000000e+00> : vector<16x128xf32>
    %54 = tpu.matmul %52, %53, %cst_24 {dimension_numbers = #tpu.dot_dimension_numbers<[1], [0], [0], [1], [0, 0, 1, 1], [], []>} : vector<16x128xbf16>, vector<128x128xbf16>, vector<16x128xf32> -> vector<16x128xf32>
    %55 = arith.addf %51, %54 : vector<16x128xf32>
    %c0_25 = arith.constant 0 : index
    %c0_26 = arith.constant 0 : index
    %56 = vector.load %arg10[%c0_25, %c0_26] : memref<1x128xf32, #tpu.memory_space<vmem>>, vector<1x128xf32>
    %57 = vector.broadcast %56 : vector<1x128xf32> to vector<16x128xf32>
    %58 = arith.addf %55, %57 : vector<16x128xf32>
    %c0_27 = arith.constant 0 : index
    %c0_28 = arith.constant 0 : index
    %59 = vector.load %arg3[%c0_27, %c0_28] : memref<16x128xf32, #tpu.memory_space<vmem>>, vector<16x128xf32>
    %60 = arith.addf %59, %58 : vector<16x128xf32>
    %c0_29 = arith.constant 0 : index
    %c0_30 = arith.constant 0 : index
    %61 = vector.load %arg11[%c0_29, %c0_30] : memref<16x128xf32, #tpu.memory_space<vmem>>, vector<16x128xf32>
    tpu.vector_store %arg11[%c0_29, %c0_30], %60 {strides = array<i32>} : memref<16x128xf32, #tpu.memory_space<vmem>>, vector<16x128xf32>,
    return
  }
  func.func @transform_0(%arg0: i32) -> (i32, i32) {
    %c0_i32 = arith.constant 0 : i32
    %c0_i32_0 = arith.constant 0 : i32
    return %arg0, %c0_i32 : i32, i32
  }
  func.func @transform_1(%arg0: i32) -> (i32, i32) {
    %c0_i32 = arith.constant 0 : i32
    %c0_i32_0 = arith.constant 0 : i32
    return %arg0, %c0_i32 : i32, i32
  }
  func.func @transform_2(%arg0: i32) -> (i32, i32) {
    %c0_i32 = arith.constant 0 : i32
    %c0_i32_0 = arith.constant 0 : i32
    return %arg0, %c0_i32 : i32, i32
  }
  func.func @transform_3(%arg0: i32) -> (i32, i32) {
    %c0_i32 = arith.constant 0 : i32
    %c0_i32_0 = arith.constant 0 : i32
    %c0_i32_1 = arith.constant 0 : i32
    return %c0_i32, %c0_i32_0 : i32, i32
  }
  func.func @transform_4(%arg0: i32) -> (i32, i32) {
    %c0_i32 = arith.constant 0 : i32
    %c0_i32_0 = arith.constant 0 : i32
    %c0_i32_1 = arith.constant 0 : i32
    return %c0_i32, %c0_i32_0 : i32, i32
  }
  func.func @transform_5(%arg0: i32) -> (i32, i32) {
    %c0_i32 = arith.constant 0 : i32
    %c0_i32_0 = arith.constant 0 : i32
    %c0_i32_1 = arith.constant 0 : i32
    return %c0_i32, %c0_i32_0 : i32, i32
  }
  func.func @transform_6(%arg0: i32) -> (i32, i32) {
    %c0_i32 = arith.constant 0 : i32
    %c0_i32_0 = arith.constant 0 : i32
    %c0_i32_1 = arith.constant 0 : i32
    return %c0_i32, %c0_i32_0 : i32, i32
  }
  func.func @transform_7(%arg0: i32) -> (i32, i32) {
    %c0_i32 = arith.constant 0 : i32
    %c0_i32_0 = arith.constant 0 : i32
    %c0_i32_1 = arith.constant 0 : i32
    return %c0_i32, %c0_i32_0 : i32, i32
  }
  func.func @transform_8(%arg0: i32) -> (i32, i32) {
    %c0_i32 = arith.constant 0 : i32
    %c0_i32_0 = arith.constant 0 : i32
    %c0_i32_1 = arith.constant 0 : i32
    return %c0_i32, %c0_i32_0 : i32, i32
  }
  func.func @transform_9(%arg0: i32) -> (i32, i32) {
    %c0_i32 = arith.constant 0 : i32
    %c0_i32_0 = arith.constant 0 : i32
    %c0_i32_1 = arith.constant 0 : i32
    return %c0_i32, %c0_i32_0 : i32, i32
  }
  func.func @transform_10(%arg0: i32) -> (i32, i32) {
    %c0_i32 = arith.constant 0 : i32
    %c0_i32_0 = arith.constant 0 : i32
    return %arg0, %c0_i32 : i32, i32
  }
}

</mosaic_0001>

<bundles_post_ra>
// kernel: deepgcn_edge_forward.3
= control target key start
LH: loop header
LB: loop body
LE: loop exit
PB: predicated region body
PF: predicated region fallthrough
CT: control target
= control target key end

     0   :  { %s436_s0 = inlined_call_operand.vmem [shape: f32[8,128], index: 0, kind: input, shape index: {}]   ;;  %s437_s1 = inlined_call_operand.vmem [shape: f32[1,128], index: 1, kind: input, shape index: {}]   ;;  %s438_s2 = inlined_call_operand.vmem [shape: f32[1,128], index: 2, kind: input, shape index: {}]   ;;  %s439_s3 = inlined_call_operand.vmem [shape: bf16[128,256], index: 3, kind: input, shape index: {}]   ;;  %s440_s4 = inlined_call_operand.vmem [shape: f32[1,256], index: 4, kind: input, shape index: {}]   ;;  %s441_s5 = inlined_call_operand.vmem [shape: bf16[8,128], index: 5, kind: output, shape index: {0}]   ;;  %s442_s6 = inlined_call_operand.vmem [shape: bf16[8,128], index: 6, kind: output, shape index: {1}]  }
   0x1   :  { %v319_v0 = vld [vmem:[%s436_s0] sm:$0xff]  ;;  %v255_v2 = vld [vmem:[%s439_s3 + $0x70] sm:$0xf]  ;;  %v276_v3 = vld [vmem:[%s439_s3 + $0x74] sm:$0xf0] }
   0x2   :  { %23 = vadd.xlane.f32.xlu0 %v319_v0  ;;  %v26_v1 = vmul.f32 %v319_v0, %v319_v0  ;;  %v275_v4 = vld [vmem:[%s439_s3 + $0x74] sm:$0xf]  ;;  %v256_v5 = vor.u32 %v276_v3, %v255_v2  ;;  %v257_v6 = vld [vmem:[%s439_s3 + $0x78] sm:$0xf0]  ;;  %v247_v8 = vld [vmem:[%s439_s3 + $0x60] sm:$0xf] }
   0x3   :  { %v260_v7 = vor.u32 %v275_v4, %v257_v6  ;;  %v274_v9 = vld [vmem:[%s439_s3 + $0x64] sm:$0xf0]  ;;  %v273_v10 = vld [vmem:[%s439_s3 + $0x64] sm:$0xf]  ;;  %v249_v12 = vld [vmem:[%s439_s3 + $0x68] sm:$0xf0] }
   0x4   :  { %159 = vmatpush.bf16.msra.mxu0 %v256_v5  ;;  %v248_v11 = vor.u32 %v274_v9, %v247_v8  ;;  %v252_v13 = vor.u32 %v273_v10, %v249_v12  ;;  %v239_v14 = vld [vmem:[%s439_s3 + $0x50] sm:$0xf]  ;;  %v272_v15 = vld [vmem:[%s439_s3 + $0x54] sm:$0xf0]  ;;  %v271_v16 = vld [vmem:[%s439_s3 + $0x54] sm:$0xf] }
   0x5   :  { %172 = vmatpush.bf16.msra.mxu1 %v260_v7  ;;  %v240_v17 = vor.u32 %v272_v15, %v239_v14  ;;  %v241_v18 = vld [vmem:[%s439_s3 + $0x58] sm:$0xf0]  ;;  %v231_v20 = vld [vmem:[%s439_s3 + $0x40] sm:$0xf]  ;;  %v270_v21 = vld [vmem:[%s439_s3 + $0x44] sm:$0xf0] }
   0x6   :  { %v244_v19 = vor.u32 %v271_v16, %v241_v18  ;;  %v269_v22 = vld [vmem:[%s439_s3 + $0x44] sm:$0xf]  ;;  %v232_v23 = vor.u32 %v270_v21, %v231_v20  ;;  %v233_v24 = vld [vmem:[%s439_s3 + $0x48] sm:$0xf0]  ;;  %v223_v26 = vld [vmem:[%s439_s3 + $0x30] sm:$0xf] }
   0x7   :  { %v236_v25 = vor.u32 %v269_v22, %v233_v24  ;;  %v268_v27 = vld [vmem:[%s439_s3 + $0x34] sm:$0xf0]  ;;  %v267_v28 = vld [vmem:[%s439_s3 + $0x34] sm:$0xf]  ;;  %v225_v30 = vld [vmem:[%s439_s3 + $0x38] sm:$0xf0] }
   0x8   :  { %160 = vmatpush.bf16.msra.mxu0 %v248_v11  ;;  %v224_v29 = vor.u32 %v268_v27, %v223_v26  ;;  %v228_v31 = vor.u32 %v267_v28, %v225_v30  ;;  %v215_v32 = vld [vmem:[%s439_s3 + $0x20] sm:$0xf]  ;;  %v266_v33 = vld [vmem:[%s439_s3 + $0x24] sm:$0xf0]  ;;  %v265_v34 = vld [vmem:[%s439_s3 + $0x24] sm:$0xf] }
   0x9   :  { %173 = vmatpush.bf16.msra.mxu1 %v252_v13  ;;  %v216_v35 = vor.u32 %v266_v33, %v215_v32  ;;  %v217_v36 = vld [vmem:[%s439_s3 + $0x28] sm:$0xf0]  ;;  %v207_v37 = vld [vmem:[%s439_s3 + $0x10] sm:$0xf]  ;;  %v264_v38 = vld [vmem:[%s439_s3 + $0x14] sm:$0xf0] }
   0xa   :  { %27 = vadd.xlane.f32.xlu0 %v26_v1  ;;  %v220_v39 = vor.u32 %v265_v34, %v217_v36  ;;  %v263_v40 = vld [vmem:[%s439_s3 + $0x14] sm:$0xf]  ;;  %v209_v41 = vld [vmem:[%s439_s3 + $0x18] sm:$0xf0]  ;;  %v208_v43 = vor.u32 %v264_v38, %v207_v37  ;;  %v199_v45 = vld [vmem:[%s439_s3] sm:$0xf] }
   0xb   :  { %v212_v44 = vor.u32 %v263_v40, %v209_v41  ;;  %v262_v46 = vld [vmem:[%s439_s3 + $0x4] sm:$0xf0]  ;;  %v261_v47 = vld [vmem:[%s439_s3 + $0x4] sm:$0xf]  ;;  %v201_v48 = vld [vmem:[%s439_s3 + $0x8] sm:$0xf0] }
   0xc   :  { %161 = vmatpush.bf16.msra.mxu0 %v240_v17  ;;  %v200_v49 = vor.u32 %v262_v46, %v199_v45  ;;  %v204_v51 = vor.u32 %v261_v47, %v201_v48  ;;  %v277_v1 = vld [vmem:[%s437_s1] ss:$0 sm:$0xff] }
   0xd   :  { %174 = vmatpush.bf16.msra.mxu1 %v244_v19  ;;  %v278_v4 = vld [vmem:[%s438_s2] ss:$0 sm:$0xff] }
  0x10   :  { %162 = vmatpush.bf16.msra.mxu0 %v232_v23 }
  0x11   :  { %175 = vmatpush.bf16.msra.mxu1 %v236_v25 }
  0x14   :  { %163 = vmatpush.bf16.msra.mxu0 %v224_v29 }
  0x15   :  { %176 = vmatpush.bf16.msra.mxu1 %v228_v31 }
  0x18   :  { %164 = vmatpush.bf16.msra.mxu0 %v216_v35 }
  0x19   :  { %177 = vmatpush.bf16.msra.mxu1 %v220_v39 }
  0x1c   :  { %165 = vmatpush.bf16.msra.mxu0 %v208_v43 }
  0x1d   :  { %178 = vmatpush.bf16.msra.mxu1 %v212_v44 }
  0x20   :  { %166 = vmatpush.bf16.msra.mxu0 %v200_v49 }
  0x21   :  { %179 = vmatpush.bf16.msra.mxu1 %v204_v51 }
  0x75   :  { %v24_v42 = vpop.xlane.xlu0 %23 }
  0x76   :  { %v25_v50 = vmul.f32 0.03125, %v24_v42 }
  0x78   :  { %v30_v53 = vmul.f32 %v25_v50, %v25_v50  ;;  %v43_v63 = vsub.f32 %v319_v0, %v25_v50  ;;  %v73_v0 = vld [vmem:[%s440_s4] sm:$0x3] }
  0x79   :  { %v75_v9 = vperm.slane %v73_v0, 0  ;;  %v76_v10 = vperm.slane %v73_v0, 1 }
  0x7d   :  { %v28_v52 = vpop.xlane.xlu0 %27 }
  0x7e   :  { %v29_v54 = vmul.f32 0.03125, %v28_v52 }
  0x80   :  { %v31_v55 = vsub.f32 %v29_v54, %v30_v53 }
  0x82   :  { %v32_v56 = vadd.f32 1e-05, %v31_v55 }
  0x84   :  { %279 = vrsqrt.f32 %v32_v56  ;;  %vm39_vm1 = vweird.f32 %v32_v56 }
  0x8a   :  { %v280_v57 = vpop.eup %279 }
  0x8b   :  { %v34_v58 = vmul.f32 %v280_v57, %v32_v56  ;;  %vm40_vm0 = vweird.f32 %v280_v57 }
  0x8c   :  { %vm41_vm2 = vmor %vm39_vm1, %vm40_vm0 }
  0x8d   :  { %v35_v59 = vmul.f32 %v280_v57, %v34_v58 }
  0x8f   :  { %v36_v60 = vmul.f32 0.5, %v35_v59 }
  0x91   :  { %v37_v61 = vsub.f32 1.5, %v36_v60 }
  0x93   :  { %v38_v62 = vmul.f32 %v280_v57, %v37_v61 }
  0x95   :  { %v42_v2 = vsel %vm41_vm2, %v280_v57, %v38_v62 }
  0x96   :  { %v44_v3 = vmul.f32 %v43_v63, %v42_v2 }
  0x98   :  { %v49_v5 = vmul.f32 %v277_v1, %v44_v3 }
  0x9a   :  { %v54_v6 = vadd.f32 %v278_v4, %v49_v5 }
  0x9c   :  { %v55_v7 = vmax.f32 %v54_v6, 0.0 }
  0x9e   :  { %v56_v8 = vpack.c.bf16 %v55_v7, %v55_v7 }
  0xa0   :  { %167 = vmatmul.bf16.vlgmr.msra.gmra.mxu0 %v56_v8  ;;  %180 = vmatmul.bf16.vlgmr.msra.gmra.mxu1 %v56_v8 }
 0x11d   :  { %v168_v11 = vpop.f32.mrf.mxu0  ;;  %v181_v12 = vpop.f32.mrf.mxu1 }
 0x11e   :  { %v169_v13 = vadd.f32 %v168_v11, %v75_v9  ;;  %v182_v14 = vadd.f32 %v181_v12, %v76_v10 }
 0x120   :  { %v185_v15 = vpack.c.bf16 %v169_v13, %v169_v13  ;;  %v187_v16 = vpack.c.bf16 %v182_v14, %v182_v14 }
 0x122   :  { %186 = vst [vmem:[%s441_s5] sm:$0xf] %v185_v15 }
 0x123   :  { %188 = vst [vmem:[%s442_s6] sm:$0xf] %v187_v16 }
 0x125   :  { %v170_v17 = vpop.f32.mrf.mxu0  ;;  %v183_v18 = vpop.f32.mrf.mxu1 }

// kernel: deepgcn_edge_forward.4
= control target key start
LH: loop header
LB: loop body
LE: loop exit
PB: predicated region body
PF: predicated region fallthrough
CT: control target
= control target key end

     0   :  { %s692_s18 = smov 0   ;;  %s767_s0 = inlined_call_operand.vmem [shape: bf16[32,128], index: 0, kind: input, shape index: {}]   ;;  %s768_s1 = inlined_call_operand.vmem [shape: bf16[32,128], index: 1, kind: input, shape index: {}]   ;;  %s769_s2 = inlined_call_operand.vmem [shape: bf16[32,128], index: 2, kind: input, shape index: {}]   ;;  %s770_s3 = inlined_call_operand.vmem [shape: bf16[128,128], index: 3, kind: input, shape index: {}]   ;;  %s771_s4 = inlined_call_operand.vmem [shape: bf16[128,8], index: 4, kind: input, shape index: {}]   ;;  %s772_s5 = inlined_call_operand.vmem [shape: f32[32,8], index: 5, kind: output, shape index: {}]  }
   0x1 LB: > { %s538_s19 = sadd.s32 4294967295, %s660_s18   ;;  %p542_p0 = scmp.ge.s32.totalorder %s660_s18, 1  ;;  %s660_s18 = sphi %s692_s18, %s15_s18  }
   0x2   : > { %p210_p1 = scmp.lt.s32.totalorder %s660_s18, 3 }
   0x4   : > { %p211_p2 = pnand %p542_p0, %p210_p1 }
   0x5   : > { %s543_s9 = sshll.u32 (!%p211_p2), %s538_s19, 1 }
   0x6   : > { %214 = sbr.rel (%p211_p2) target bundleno = 319 (0x13f), region = 40  ;;  %p249_p3 = scmp.lt.s32.totalorder (!%p211_p2), %s543_s9, 3 }
   0xb   : > { %v629_v0 = vld [vmem:[%s770_s3 + $0x38] sm:$0xff]  ;;  %v628_v1 = vld [vmem:[%s770_s3 + $0x30] sm:$0xff]  ;;  %v627_v4 = vld [vmem:[%s770_s3 + $0x28] sm:$0xff]  ;;  %s774_s9 = smov (!%p249_p3, %s543_s9), 3  ;;  %vm455_vm2 = vcmask 64512  }
   0xc   : > { %344 = vmatpush.bf16.msra.mxu0 %v629_v0  ;;  %v637_v2 = vld [vmem:[%s771_s4 + $0x38] sm:$0xff]  ;;  %v636_v3 = vld [vmem:[%s771_s4 + $0x30] sm:$0xff]  ;;  %v635_v5 = vld [vmem:[%s771_s4 + $0x28] sm:$0xff]  ;;  %s544_s19 = sshll.u32 %s774_s9, 2  ;;  %s550_s15 = sshll.u32 %s774_s9, 3 }
   0xd   : > { %441 = vmatpush.bf16.msra.mxu1 %v637_v2  ;;  %v626_v6 = vld [vmem:[%s770_s3 + $0x20] sm:$0xff]  ;;  %v625_v8 = vld [vmem:[%s770_s3 + $0x18] sm:$0xff]  ;;  %v624_v9 = vld [vmem:[%s770_s3 + $0x10] sm:$0xff]  ;;  %s264_s24 = scalar_lea.vmem %s769_s2, %s544_s19  ;;  %s252_s11 = scalar_lea.vmem %s767_s0, %s544_s19 }
   0xe   : > { %v634_v7 = vld [vmem:[%s771_s4 + $0x20] sm:$0xff]  ;;  %v623_v10 = vld [vmem:[%s770_s3 + $0x8] sm:$0xff]  ;;  %v633_v13 = vld [vmem:[%s771_s4 + $0x18] sm:$0xff]  ;;  %s258_s14 = scalar_lea.vmem %s768_s1, %s544_s19  ;;  %s270_s19 = scalar_lea.vmem %s772_s5, %s550_s15 }
   0xf   : > { %v622_v11 = vld [vmem:[%s770_s3] sm:$0xff]  ;;  %v632_v14 = vld [vmem:[%s771_s4 + $0x10] sm:$0xff]  ;;  %v631_v15 = vld [vmem:[%s771_s4 + $0x8] sm:$0xff] }
  0x10   : > { %345 = vmatpush.bf16.msra.mxu0 %v628_v1  ;;  %v621_v12 = vld [vmem:[%s264_s24] sm:$0xff] }
  0x11   : > { %442 = vmatpush.bf16.msra.mxu1 %v636_v3  ;;  %v630_v16 = vld [vmem:[%s771_s4] sm:$0xff] }
  0x12   : > { %v639_v17 = vld [vmem:[%s252_s11] sm:$0xff]  }
  0x13   : > { %v643_v18 = vld [vmem:[%s258_s14] sm:$0xff]   ;;  %v640_v19 = vunpack.c.l.bf16 %v639_v17  ;;  %v641_v23 = vunpack.c.h.bf16 %v639_v17 }
  0x14   : > { %346 = vmatpush.bf16.msra.mxu0 %v627_v4  ;;  %v644_v20 = vunpack.c.l.bf16 %v643_v18  ;;  %v645_v24 = vunpack.c.h.bf16 %v643_v18 }
  0x15   : > { %443 = vmatpush.bf16.msra.mxu1 %v635_v5 }
  0x16   : > { %v366_v22 = vadd.f32 %v644_v20, %v640_v19  ;;  %v367_v26 = vadd.f32 %v645_v24, %v641_v23 }
  0x18   : > { %347 = vmatpush.bf16.msra.mxu0 %v626_v6 }
  0x19   : > { %444 = vmatpush.bf16.msra.mxu1 %v634_v7 }
  0x1c   : > { %348 = vmatpush.bf16.msra.mxu0 %v625_v8 }
  0x1d   : > { %445 = vmatpush.bf16.msra.mxu1 %v633_v13 }
  0x20   : > { %349 = vmatpush.bf16.msra.mxu0 %v624_v9 }
  0x21   : > { %446 = vmatpush.bf16.msra.mxu1 %v632_v14 }
  0x24   : > { %350 = vmatpush.bf16.msra.mxu0 %v623_v10 }
  0x25   : > { %447 = vmatpush.bf16.msra.mxu1 %v631_v15 }
  0x28   : > { %351 = vmatpush.bf16.msra.mxu0 %v622_v11 }
  0x29   : > { %448 = vmatpush.bf16.msra.mxu1 %v630_v16 }
  0x2b   : > { %352 = vmatmul.bf16.vlgmr.msra.gmra.mxu0 %v621_v12 }
  0xa8   : > { %v353_v21 = vpop.f32.mrf.mxu0 }
  0xa9   : > { %v368_v25 = vadd.f32 %v366_v22, %v353_v21 }
  0xab   : > { %v372_v28 = vmul.f32 0.2, %v368_v25  ;;  %vm370_vm0 = vcmp.gt.f32.partialorder %v368_v25, 0.0 }
  0xad   : > { %v374_v31 = vsel %vm370_vm0, %v368_v25, %v372_v28 }
  0xb0   : > { %v355_v27 = vpop.f32.mrf.mxu0 }
  0xb1   : > { %v369_v29 = vadd.f32 %v367_v26, %v355_v27 }
  0xb3   : > { %v373_v30 = vmul.f32 0.2, %v369_v29  ;;  %vm371_vm1 = vcmp.gt.f32.partialorder %v369_v29, 0.0 }
  0xb5   : > { %v375_v32 = vsel %vm371_vm1, %v369_v29, %v373_v30 }
  0xb6   : > { %v376_v33 = vpack.c.bf16 %v375_v32, %v374_v31 }
  0xb8   : > { %449 = vmatmul.bf16.vlgmr.msra.gmra.mxu1 %v376_v33 }
 0x135   : > { %v450_v34 = vpop.f32.mrf.mxu1 }
 0x136   : > { %456 = vst.msk [vmem:[%s270_s19] sm:$0xff] %vm455_vm2, %v450_v34 }
 0x13d   : > { %v452_v35 = vpop.f32.mrf.mxu1 }
 0x13e   : > { %457 = vst.msk [vmem:[%s270_s19 + $0x8] sm:$0xff] %vm455_vm2, %v452_v35 }
 0x13f PF: > { %s15_s18 = sadd.s32 1, %s660_s18  }
 0x140   : > { %p12_p4 = scmp.ge.s32.totalorder %s15_s18, 4  }
 0x142   :  { %14 = sbr.rel (!%p12_p4) target bundleno = 1 (0x1), region = 76 }

// kernel: deepgcn_edge_forward.5
= control target key start
LH: loop header
LB: loop body
LE: loop exit
PB: predicated region body
PF: predicated region fallthrough
CT: control target
= control target key end

     0   :  { %s608_s0 = inlined_call_operand.vmem [shape: bf16[16,128], index: 0, kind: input, shape index: {}]   ;;  %s609_s1 = inlined_call_operand.vmem [shape: bf16[16,128], index: 1, kind: input, shape index: {}]   ;;  %s610_s2 = inlined_call_operand.vmem [shape: f32[16,128], index: 2, kind: input, shape index: {}]   ;;  %s611_s3 = inlined_call_operand.vmem [shape: f32[1,128], index: 3, kind: input, shape index: {}]   ;;  %s612_s4 = inlined_call_operand.vmem [shape: f32[1,128], index: 4, kind: input, shape index: {}]   ;;  %s613_s5 = inlined_call_operand.vmem [shape: f32[1,128], index: 5, kind: input, shape index: {}]   ;;  %s614_s6 = inlined_call_operand.vmem [shape: f32[1,128], index: 6, kind: input, shape index: {}]   ;;  %s615_s7 = inlined_call_operand.vmem [shape: bf16[128,128], index: 7, kind: input, shape index: {}]   ;;  %s616_s8 = inlined_call_operand.vmem [shape: bf16[128,128], index: 8, kind: input, shape index: {}]   ;;  %s617_s9 = inlined_call_operand.vmem [shape: f32[1,128], index: 9, kind: input, shape index: {}]   ;;  %s618_s10 = inlined_call_operand.hbm [shape: f32[16,128], index: 10, kind: output, shape index: {}]  }
   0x1   :  { %v407_v0 = vld [vmem:[%s609_s1] sm:$0xff]  }
   0x2   :  { %v403_v1 = vld [vmem:[%s608_s0] sm:$0xff]   ;;  %v512_v2 = vunpack.c.l.bf16 %v407_v0 }
   0x3   :  { %v514_v3 = vunpack.c.l.bf16 %v403_v1 }
   0x4   :  { %15 = vsyncpa [#allocation3], 0  ;;  %48 = vadd.xlane.f32.xlu1 %v512_v2  ;;  %v520_v5 = vunpack.c.h.bf16 %v407_v0  ;;  %v522_v6 = vunpack.c.h.bf16 %v403_v1  ;;  %v62_v9 = vmul.f32 %v512_v2, %v512_v2  ;;  %v401_v10 = vld [vmem:[%s616_s8 + $0x38] sm:$0xff]  ;;  %v400_v12 = vld [vmem:[%s616_s8 + $0x30] sm:$0xff]  ;;  %s448_s11 = smov [#allocation2]   ;;  %s310_s15 = sshll.u32 %s618_s10, 4  ;;  %s311_s15 = int_to_ptr.hbm [resolvable:$true] %s310_s15 }
   0x5   :  { %44 = vadd.xlane.f32.xlu0 %v514_v3  ;;  %v56_v4 = vmul.f32 %v514_v3, %v514_v3  ;;  %v393_v11 = vld [vmem:[%s615_s7 + $0x38] sm:$0xff]  ;;  %216 = vmatpush.bf16.msra.mxu0 %v401_v10  ;;  %v392_v13 = vld [vmem:[%s615_s7 + $0x30] sm:$0xff]  ;;  %v399_v14 = vld [vmem:[%s616_s8 + $0x28] sm:$0xff]  ;;  %s308_s12 = sshll.u32 %s448_s11, 4  ;;  %s449_s0 = smov 128   ;;  %s309_s12 = int_to_ptr.vmem [resolvable:$true] %s308_s12 }
   0x6   :  { %v57_v7 = vmul.f32 %v522_v6, %v522_v6  ;;  %v63_v8 = vmul.f32 %v520_v5, %v520_v5  ;;  %278 = vmatpush.bf16.msra.mxu1 %v393_v11  ;;  %v391_v15 = vld [vmem:[%s615_s7 + $0x28] sm:$0xff]  ;;  %v398_v18 = vld [vmem:[%s616_s8 + $0x20] sm:$0xff]  ;;  %v397_v21 = vld [vmem:[%s616_s8 + $0x18] sm:$0xff]  ;;  %s450_s1 = smov 8  }
   0x7   :  { %58 = vadd.xlane.f32.xlu2 %v56_v4  ;;  %v390_v19 = vld [vmem:[%s615_s7 + $0x20] sm:$0xff]  ;;  %v389_v22 = vld [vmem:[%s615_s7 + $0x18] sm:$0xff]  ;;  %v396_v25 = vld [vmem:[%s616_s8 + $0x10] sm:$0xff] }
   0x8   :  { %v388_v26 = vld [vmem:[%s615_s7 + $0x10] sm:$0xff]  ;;  %v395_v29 = vld [vmem:[%s616_s8 + $0x8] sm:$0xff]  ;;  %v394_v34 = vld [vmem:[%s616_s8] sm:$0xff] }
   0x9   :  { %217 = vmatpush.bf16.msra.mxu0 %v400_v12  ;;  %v387_v30 = vld [vmem:[%s615_s7 + $0x8] sm:$0xff]  ;;  %v386_v35 = vld [vmem:[%s615_s7] sm:$0xff] }
   0xa   :  { %279 = vmatpush.bf16.msra.mxu1 %v392_v13  ;;  %v413_v62 = vld [vmem:[%s613_s5] ss:$0 sm:$0xff] }
   0xb   :  { %v415_v63 = vld [vmem:[%s611_s3] ss:$0 sm:$0xff] }
   0xc   :  { %50 = vadd.xlane.f32.xlu1 %v520_v5 }
   0xd   :  { %46 = vadd.xlane.f32.xlu0 %v522_v6  ;;  %218 = vmatpush.bf16.msra.mxu0 %v399_v14 }
   0xe   :  { %280 = vmatpush.bf16.msra.mxu1 %v391_v15 }
   0xf   :  { %60 = vadd.xlane.f32.xlu2 %v57_v7 }
  0x11   :  { %219 = vmatpush.bf16.msra.mxu0 %v398_v18 }
  0x12   :  { %281 = vmatpush.bf16.msra.mxu1 %v390_v19 }
  0x14   :  { %66 = vadd.xlane.f32.xlu1 %v63_v8 }
  0x15   :  { %64 = vadd.xlane.f32.xlu0 %v62_v9  ;;  %220 = vmatpush.bf16.msra.mxu0 %v397_v21  ;;  %v416_v9 = vld [vmem:[%s612_s4] ss:$0 sm:$0xff] }
  0x16   :  { %282 = vmatpush.bf16.msra.mxu1 %v389_v22 }
  0x19   :  { %221 = vmatpush.bf16.msra.mxu0 %v396_v25 }
  0x1a   :  { %283 = vmatpush.bf16.msra.mxu1 %v388_v26 }
  0x1d   :  { %222 = vmatpush.bf16.msra.mxu0 %v395_v29 }
  0x1e   :  { %284 = vmatpush.bf16.msra.mxu1 %v387_v30 }
  0x21   :  { %223 = vmatpush.bf16.msra.mxu0 %v394_v34  ;;  %v299_v34 = vld [vmem:[%s610_s2 + $0x8] sm:$0xff] }
  0x22   :  { %285 = vmatpush.bf16.msra.mxu1 %v386_v35 }
  0x77   :  { %v49_v16 = vpop.xlane.xlu1 %48 }
  0x78   :  { %v45_v17 = vpop.xlane.xlu0 %44 }
  0x79   :  { %v52_v27 = vadd.f32 %v49_v16, %v45_v17 }
  0x7a   :  { %v59_v20 = vpop.xlane.xlu2 %58 }
  0x7b   :  { %v54_v32 = vmul.f32 0.015625, %v52_v27 }
  0x7d   :  { %v72_v40 = vmul.f32 %v54_v32, %v54_v32  ;;  %v98_v59 = vsub.f32 %v514_v3, %v54_v32  ;;  %v116_v60 = vsub.f32 %v512_v2, %v54_v32  ;;  %v414_v2 = vld [vmem:[%s614_s6] ss:$0 sm:$0xff] }
  0x7f   :  { %v51_v23 = vpop.xlane.xlu1 %50 }
  0x80   :  { %v47_v24 = vpop.xlane.xlu0 %46 }
  0x81   :  { %v53_v28 = vadd.f32 %v51_v23, %v47_v24  ;;  %v417_v24 = vld [vmem:[%s617_s9] ss:$0 sm:$0xff] }
  0x82   :  { %v61_v31 = vpop.xlane.xlu2 %60 }
  0x83   :  { %v55_v33 = vmul.f32 0.015625, %v53_v28  ;;  %v298_v28 = vld [vmem:[%s610_s2] sm:$0xff] }
  0x85   :  { %v73_v42 = vmul.f32 %v55_v33, %v55_v33  ;;  %v99_v0 = vsub.f32 %v522_v6, %v55_v33  ;;  %v117_v1 = vsub.f32 %v520_v5, %v55_v33 }
  0x87   :  { %v67_v36 = vpop.xlane.xlu1 %66 }
  0x88   :  { %v65_v37 = vpop.xlane.xlu0 %64  ;;  %v69_v39 = vadd.f32 %v67_v36, %v61_v31 }
  0x89   :  { %v68_v38 = vadd.f32 %v65_v37, %v59_v20 }
  0x8a   :  { %v71_v43 = vmul.f32 0.015625, %v69_v39 }
  0x8b   :  { %v70_v41 = vmul.f32 0.015625, %v68_v38 }
  0x8c   :  { %v75_v45 = vsub.f32 %v71_v43, %v73_v42 }
  0x8d   :  { %v74_v44 = vsub.f32 %v70_v41, %v72_v40 }
  0x8e   :  { %v77_v47 = vadd.f32 1e-05, %v75_v45 }
  0x8f   :  { %v76_v46 = vadd.f32 1e-05, %v74_v44 }
  0x90   :  { %vm94_vm4 = vweird.f32 %v77_v47 }
  0x91   :  { %418 = vrsqrt.f32 %v76_v46  ;;  %vm84_vm2 = vweird.f32 %v76_v46 }
  0x92   :  { %420 = vrsqrt.f32 %v77_v47 }
  0x97   :  { %v419_v48 = vpop.eup %418 }
  0x98   :  { %v421_v49 = vpop.eup %420  ;;  %v79_v50 = vmul.f32 %v419_v48, %v76_v46  ;;  %vm85_vm0 = vweird.f32 %v419_v48 }
  0x99   :  { %v89_v51 = vmul.f32 %v421_v49, %v77_v47  ;;  %vm95_vm1 = vweird.f32 %v421_v49  ;;  %vm86_vm3 = vmor %vm84_vm2, %vm85_vm0 }
  0x9a   :  { %v80_v52 = vmul.f32 %v419_v48, %v79_v50  ;;  %vm96_vm5 = vmor %vm94_vm4, %vm95_vm1 }
  0x9b   :  { %v90_v53 = vmul.f32 %v421_v49, %v89_v51 }
  0x9c   :  { %v81_v54 = vmul.f32 0.5, %v80_v52 }
  0x9d   :  { %v91_v55 = vmul.f32 0.5, %v90_v53 }
  0x9e   :  { %v82_v56 = vsub.f32 1.5, %v81_v54 }
  0x9f   :  { %v92_v57 = vsub.f32 1.5, %v91_v55 }
  0xa0   :  { %v83_v58 = vmul.f32 %v419_v48, %v82_v56 }
  0xa1   :  { %v93_v61 = vmul.f32 %v421_v49, %v92_v57 }
  0xa2   :  { %v87_v4 = vsel %vm86_vm3, %v419_v48, %v83_v58 }
  0xa3   :  { %v97_v3 = vsel %vm96_vm5, %v421_v49, %v93_v61  ;;  %v118_v7 = vmul.f32 %v116_v60, %v87_v4  ;;  %v100_v8 = vmul.f32 %v98_v59, %v87_v4 }
  0xa4   :  { %v119_v10 = vmul.f32 %v117_v1, %v97_v3  ;;  %v101_v11 = vmul.f32 %v99_v0, %v97_v3 }
  0xa5   :  { %v124_v12 = vmul.f32 %v413_v62, %v118_v7  ;;  %v106_v13 = vmul.f32 %v415_v63, %v100_v8 }
  0xa6   :  { %v125_v6 = vmul.f32 %v413_v62, %v119_v10  ;;  %v107_v14 = vmul.f32 %v415_v63, %v101_v11 }
  0xa7   :  { %v130_v5 = vadd.f32 %v414_v2, %v124_v12  ;;  %v112_v15 = vadd.f32 %v416_v9, %v106_v13 }
  0xa8   :  { %v131_v16 = vadd.f32 %v414_v2, %v125_v6  ;;  %v113_v17 = vadd.f32 %v416_v9, %v107_v14 }
  0xa9   :  { %v132_v18 = vmax.f32 %v130_v5, 0.0  ;;  %v114_v19 = vmax.f32 %v112_v15, 0.0 }
  0xaa   :  { %v133_v20 = vmax.f32 %v131_v16, 0.0  ;;  %v115_v21 = vmax.f32 %v113_v17, 0.0 }
  0xac   :  { %v151_v22 = vpack.c.bf16 %v133_v20, %v132_v18  ;;  %v134_v23 = vpack.c.bf16 %v115_v21, %v114_v19 }
  0xae   :  { %224 = vmatmul.bf16.vlgmr.msra.gmra.mxu0 %v151_v22  ;;  %286 = vmatmul.bf16.vlgmr.msra.gmra.mxu1 %v134_v23 }
 0x12b   :  { %v225_v25 = vpop.f32.mrf.mxu0  ;;  %v287_v26 = vpop.f32.mrf.mxu1 }
 0x12c   :  { %v288_v27 = vadd.f32 %v287_v26, %v225_v25 }
 0x12e   :  { %v296_v29 = vadd.f32 %v417_v24, %v288_v27 }
 0x130   :  { %v300_v30 = vadd.f32 %v298_v28, %v296_v29 }
 0x132   :  { %302 = vst [vmem:[#allocation2] sm:$0xff] %v300_v30 }
 0x133   :  { %v227_v31 = vpop.f32.mrf.mxu0  ;;  %v289_v32 = vpop.f32.mrf.mxu1 }
 0x134   :  { %v290_v33 = vadd.f32 %v289_v32, %v227_v31 }
 0x136   :  { %v297_v35 = vadd.f32 %v417_v24, %v290_v33 }
 0x138   :  { %v301_v36 = vadd.f32 %v299_v34, %v297_v35 }
 0x13a   :  { %303 = vst [vmem:[#allocation2 + $0x8] sm:$0xff] %v301_v36 }
 0x13b   :  { %316 = dma.vmem_to_hbm [thread:$0]  %s309_s12, 256, %s311_s15, [#allocation3], %s449_s0, %s449_s0, %s450_s1  }
 0x13c   :  { %446 = dma.done.wait [#allocation3], 256  }
 0x13d   :  { %447 = vsyncadd [#allocation3], 4294967040 }
 0x13e   :  { %321 = vsyncpa [#allocation3], 1 }

</bundles_post_ra>
